<compile_context>
chip_gen: v5e
topology: v5e:2x2
jax: 0.10.0
libtpu: 0.0.40
codegen_flags: <defaults>
</compile_context>

<pallas_src>
import jax
import jax.numpy as jnp
from jax.experimental import pallas as pl
from jax.experimental.pallas import tpu as pltpu

_LANE = 128
_SUBLANE = 8


def _round_up(x, m):
    return (x + m - 1) // m * m


def _default_vmem_limit_bytes():
    """Generation-aware scoped-VMEM limit (conservative fallback: 48 MiB)."""
    try:
        info = pltpu.get_tpu_info()
        cap = getattr(info, "vmem_capacity_bytes", None)
        if cap:
            # v5e/v6e (128 MiB physical) -> 64 MiB; v7x (64 MiB) -> 48 MiB.
            return int(min(64 << 20, cap * 3 // 4))
    except Exception:
        pass
    return 48 << 20


# --------------------------------------------------------------------------- #
# Kernel
# --------------------------------------------------------------------------- #
def _ae_kernel(x_ref, w_enc_ref, b_enc_ref, w_dec_ref, b_dec_ref, out_ref):
    # x_ref:     (TB, D)   input tile (pipelined over the batch grid)
    # w_enc_ref: (D, Lp)   bf16 encoder weight   (VMEM-resident across steps)
    # b_enc_ref: (1, Lp)   f32 encoder bias
    # w_dec_ref: (Lp, D)   bf16 decoder weight   (VMEM-resident across steps)
    # b_dec_ref: (1, D)    f32 decoder bias
    # out_ref:   (TB, D)   reconstructed output tile
    x = x_ref[...]

    # encoder: Linear + ReLU.  bf16 MXU operands, f32 accumulation, f32 VPU.
    h = jnp.dot(x.astype(jnp.bfloat16), w_enc_ref[...],
                preferred_element_type=jnp.float32)
    h = jnp.maximum(h + b_enc_ref[...], 0.0)

    # decoder: Linear + Sigmoid (sigmoid exp/recip on the EUP, f32).
    y = jnp.dot(h.astype(jnp.bfloat16), w_dec_ref[...],
                preferred_element_type=jnp.float32)
    y = y + b_dec_ref[...]
    out_ref[...] = jax.nn.sigmoid(y).astype(out_ref.dtype)


# --------------------------------------------------------------------------- #
# One-time parameter preparation (hoisted out of the per-call path)
# --------------------------------------------------------------------------- #
def prepare_autoencoder_params(w_enc, b_enc, w_dec, b_dec):
    """Pad LATENT to a full lane width and cast weights to bf16, ONCE.

    Padded encoder columns / bias entries are zero -> ReLU(0) = 0, and the
    matching zero decoder rows contribute nothing, so the math is unchanged
    while the MXU contract/lane dims fill.  Do this once per parameter set,
    not per forward call (it costs ~a full kernel's worth of HBM traffic).
    """
    d, latent = w_enc.shape
    lp = max(_LANE, _round_up(latent, _LANE))
    w_enc_p = jnp.zeros((d, lp), jnp.bfloat16).at[:, :latent].set(
        w_enc.astype(jnp.bfloat16))
    b_enc_p = jnp.zeros((1, lp), jnp.float32).at[:, :latent].set(
        b_enc.reshape(1, latent).astype(jnp.float32))
    w_dec_p = jnp.zeros((lp, d), jnp.bfloat16).at[:latent, :].set(
        w_dec.astype(jnp.bfloat16))
    b_dec_p = b_dec.reshape(1, d).astype(jnp.float32)
    return w_enc_p, b_enc_p, w_dec_p, b_dec_p


# --------------------------------------------------------------------------- #
# Forward
# --------------------------------------------------------------------------- #
def autoencoder_forward(x_nchw, params, *, out_dtype=jnp.float32,
                        block_batch=512, vmem_limit_bytes=None):
    """Forward pass matching Autoencoder.forward: decoder(encoder(x)).

    x_nchw: (N, C, H, W), float32 or bfloat16 (streamed in its own dtype)
    params: output of prepare_autoencoder_params (padded bf16 weights, f32 biases)
    out_dtype: output element type; bf16 halves output HBM bytes if tolerable.
    returns: (N, C, H, W) out_dtype
    """
    w_enc_p, b_enc_p, w_dec_p, b_dec_p = params
    n, c, h, w = x_nchw.shape
    d = c * h * w
    lp = w_enc_p.shape[1]
    assert w_enc_p.shape[0] == d and w_dec_p.shape == (lp, d)

    if vmem_limit_bytes is None:
        vmem_limit_bytes = _default_vmem_limit_bytes()

    # ---- wrapper-side layout prep (free reshape; NO extra dtype pass) -------
    x2d = x_nchw.reshape(n, d)
    if x2d.dtype not in (jnp.float32, jnp.bfloat16):
        x2d = x2d.astype(jnp.float32)
    x_isz = jnp.dtype(x2d.dtype).itemsize
    o_isz = jnp.dtype(out_dtype).itemsize

    # Pad batch only to a sublane multiple; the grid handles the ragged tail.
    n_pad = _round_up(n, _SUBLANE)
    if n_pad > n:
        x2d = jnp.pad(x2d, ((0, n_pad - n), (0, 0)))

    # ---- batch tile selection, under an explicit VMEM budget ----------------
    # Per-row bytes: double-buffered x/out tiles + in-kernel temporaries
    # (bf16 copy of x, f32 y before sigmoid, h in f32 + bf16).
    per_row = (2 * (x_isz + o_isz) * d   # 2-deep pipeline for x and out tiles
               + 2 * d                   # bf16 x copy
               + 4 * d                   # f32 y
               + 6 * lp)                 # h f32 + bf16
    fixed = (2 * d * lp * 2              # resident bf16 weights
             + (lp + d) * 4              # f32 biases
             + (1 << 20))                # slack for compiler-internal scratch
    tb_budget = max(_SUBLANE,
                    max(0, vmem_limit_bytes - fixed) // per_row
                    // _SUBLANE * _SUBLANE)
    tb = max(_SUBLANE, min(block_batch, tb_budget, n_pad))

    # Large batch but a single grid step would leave one v7x TensorCore idle:
    # split into (at least) two balanced tiles.
    if n_pad >= 256 and pl.cdiv(n_pad, tb) == 1:
        tb = _round_up(pl.cdiv(n_pad, 2), _SUBLANE)

    grid_steps = pl.cdiv(n_pad, tb)
    rows = grid_steps * tb  # rows actually pushed through the pipeline

    cost = pl.CostEstimate(
        flops=4 * rows * d * lp,                        # two matmuls
        transcendentals=2 * rows * d,                   # sigmoid: exp + recip
        bytes_accessed=(n_pad * d * (x_isz + o_isz)     # x in + out
                        + 2 * d * lp * 2                # bf16 weights
                        + (lp + d) * 4),                # biases
    )

    out2d = pl.pallas_call(
        _ae_kernel,
        out_shape=jax.ShapeDtypeStruct((n_pad, d), out_dtype),
        grid=(grid_steps,),
        in_specs=[
            pl.BlockSpec((tb, d), lambda i: (i, 0)),     # x: pipelined tiles
            pl.BlockSpec((d, lp), lambda i: (0, 0)),     # weights: resident
            pl.BlockSpec((1, lp), lambda i: (0, 0)),
            pl.BlockSpec((lp, d), lambda i: (0, 0)),
            pl.BlockSpec((1, d), lambda i: (0, 0)),
        ],
        out_specs=pl.BlockSpec((tb, d), lambda i: (i, 0)),
        compiler_params=pltpu.CompilerParams(
            # independent batch tiles -> shard across v7x's 2 TensorCores
            dimension_semantics=("parallel",),
            vmem_limit_bytes=int(vmem_limit_bytes),
        ),
        cost_estimate=cost,
    )(x2d, w_enc_p, b_enc_p, w_dec_p, b_dec_p)

    # glue: drop batch padding, unflatten back to NCHW
    return out2d[:n].reshape(n, c, h, w)


def autoencoder_forward_unprepared(x_nchw, w_enc, b_enc, w_dec, b_dec, **kw):
    """Convenience wrapper; prefer preparing params once and reusing them."""
    params = prepare_autoencoder_params(w_enc, b_enc, w_dec, b_dec)
    return autoencoder_forward(x_nchw, params, **kw)


# --------------------------------------------------------------------------- #
# Pure-JAX reference
# --------------------------------------------------------------------------- #
def _reference_forward(x_nchw, w_enc, b_enc, w_dec, b_dec,
                       matmul_dtype=jnp.float32):
    n, c, h, w = x_nchw.shape
    x2d = x_nchw.reshape(n, -1)
    hid = jnp.dot(x2d.astype(matmul_dtype), w_enc.astype(matmul_dtype),
                  preferred_element_type=jnp.float32)
    hid = jnp.maximum(hid + b_enc.reshape(1, -1), 0.0)
    y = jnp.dot(hid.astype(matmul_dtype), w_dec.astype(matmul_dtype),
                preferred_element_type=jnp.float32)
    y = jax.nn.sigmoid(y + b_dec.reshape(1, -1))
    return y.reshape(n, c, h, w)


if __name__ == "__main__":
    # small shapes consistent with the module: batch=2, channels=4, spatial=16
    N, C, H, W = 2, 4, 16, 16
    D = C * H * W          # 1024
    LATENT = 32

    key = jax.random.PRNGKey(0)
    k_x, k_we, k_be, k_wd, k_bd = jax.random.split(key, 5)

    x = jax.random.uniform(k_x, (N, C, H, W), dtype=jnp.float32)

    # deterministic parameter init (torch Linear-style uniform bounds)
    bound_e = 1.0 / jnp.sqrt(jnp.float32(D))
    bound_d = 1.0 / jnp.sqrt(jnp.float32(LATENT))
    w_enc = jax.random.uniform(k_we, (D, LATENT), jnp.float32, -bound_e, bound_e)
    b_enc = jax.random.uniform(k_be, (LATENT,), jnp.float32, -bound_e, bound_e)
    w_dec = jax.random.uniform(k_wd, (LATENT, D), jnp.float32, -bound_d, bound_d)
    b_dec = jax.random.uniform(k_bd, (D,), jnp.float32, -bound_d, bound_d)

    # One-time parameter prep (padded + bf16-cast), reused across forward calls.
    params = prepare_autoencoder_params(w_enc, b_enc, w_dec, b_dec)
    params = jax.block_until_ready(params)

    out = autoencoder_forward(x, params)
    out = jax.block_until_ready(out)
    assert out.shape == (N, C, H, W)
    assert out.dtype == jnp.float32

    # Tight check vs. a reference using the same bf16 matmul operands / f32 acc.
    ref_bf16 = _reference_forward(x, w_enc, b_enc, w_dec, b_dec,
                                  matmul_dtype=jnp.bfloat16)
    assert jnp.allclose(out, ref_bf16, atol=2e-3, rtol=2e-3)

    # Loose check vs. the pure-f32 reference (bf16 weight rounding only).
    ref_f32 = _reference_forward(x, w_enc, b_enc, w_dec, b_dec,
                                 matmul_dtype=jnp.float32)
    assert jnp.allclose(out, ref_f32, atol=3e-2, rtol=3e-2)

    # Also exercise the bf16-output fast path (halves output HBM bytes).
    out_bf16 = autoencoder_forward(x, params, out_dtype=jnp.bfloat16)
    out_bf16 = jax.block_until_ready(out_bf16)
    assert out_bf16.dtype == jnp.bfloat16
    assert jnp.allclose(out_bf16.astype(jnp.float32), ref_f32,
                        atol=5e-2, rtol=5e-2)

    print("KERNEL_OK")
</pallas_src>

<mosaic_0001>
module attributes {stable_mosaic.version = 11 : i64} {
  func.func @_ae_kernel(%arg0: i32, %arg1: memref<8x1024xf32, #tpu.memory_space<vmem>>, %arg2: memref<1024x128xbf16, #tpu.memory_space<vmem>>, %arg3: memref<1x128xf32, #tpu.memory_space<vmem>>, %arg4: memref<128x1024xbf16, #tpu.memory_space<vmem>>, %arg5: memref<1x1024xf32, #tpu.memory_space<vmem>>, %arg6: memref<8x1024xf32, #tpu.memory_space<vmem>>) attributes {dimension_semantics = [#tpu.dimension_semantics<parallel>], iteration_bounds = array<i64: 1>, scalar_prefetch = 0 : i64, scratch_operands = 0 : i64, tpu.core_type = #tpu.core_type<tc>, window_params = [{transform_indices = @transform_0, window_bounds = array<i64: 8, 1024>}, {pipeline_mode = #tpu.pipeline_mode<synchronous>, transform_indices = @transform_1, window_bounds = array<i64: 1024, 128>}, {pipeline_mode = #tpu.pipeline_mode<synchronous>, transform_indices = @transform_2, window_bounds = array<i64: 1, 128>}, {pipeline_mode = #tpu.pipeline_mode<synchronous>, transform_indices = @transform_3, window_bounds = array<i64: 128, 1024>}, {pipeline_mode = #tpu.pipeline_mode<synchronous>, transform_indices = @transform_4, window_bounds = array<i64: 1, 1024>}, {transform_indices = @transform_5, window_bounds = array<i64: 8, 1024>}]} {
    %c0 = arith.constant 0 : index
    %c0_0 = arith.constant 0 : index
    %0 = vector.load %arg1[%c0, %c0_0] : memref<8x1024xf32, #tpu.memory_space<vmem>>, vector<8x1024xf32>
    %1 = arith.truncf %0 : vector<8x1024xf32> to vector<8x1024xbf16>
    %c0_1 = arith.constant 0 : index
    %c0_2 = arith.constant 0 : index
    %2 = vector.load %arg2[%c0_1, %c0_2] : memref<1024x128xbf16, #tpu.memory_space<vmem>>, vector<1024x128xbf16>
    %cst = arith.constant dense<0.000000e+00> : vector<8x128xf32>
    %3 = tpu.matmul %1, %2, %cst {dimension_numbers = #tpu.dot_dimension_numbers<[1], [0], [0], [1], [0, 0, 1, 1], [], []>} : vector<8x1024xbf16>, vector<1024x128xbf16>, vector<8x128xf32> -> vector<8x128xf32>
    %c0_3 = arith.constant 0 : index
    %c0_4 = arith.constant 0 : index
    %4 = vector.load %arg3[%c0_3, %c0_4] : memref<1x128xf32, #tpu.memory_space<vmem>>, vector<1x128xf32>
    %5 = vector.broadcast %4 : vector<1x128xf32> to vector<8x128xf32>
    %6 = arith.addf %3, %5 : vector<8x128xf32>
    %cst_5 = arith.constant 0.000000e+00 : f32
    %7 = vector.broadcast %cst_5 : f32 to vector<8x128xf32>
    %8 = arith.maximumf %6, %7 : vector<8x128xf32>
    %9 = arith.truncf %8 : vector<8x128xf32> to vector<8x128xbf16>
    %c0_6 = arith.constant 0 : index
    %c0_7 = arith.constant 0 : index
    %10 = vector.load %arg4[%c0_6, %c0_7] : memref<128x1024xbf16, #tpu.memory_space<vmem>>, vector<128x1024xbf16>
    %cst_8 = arith.constant dense<0.000000e+00> : vector<8x1024xf32>
    %11 = tpu.matmul %9, %10, %cst_8 {dimension_numbers = #tpu.dot_dimension_numbers<[1], [0], [0], [1], [0, 0, 1, 1], [], []>} : vector<8x128xbf16>, vector<128x1024xbf16>, vector<8x1024xf32> -> vector<8x1024xf32>
    %c0_9 = arith.constant 0 : index
    %c0_10 = arith.constant 0 : index
    %12 = vector.load %arg5[%c0_9, %c0_10] : memref<1x1024xf32, #tpu.memory_space<vmem>>, vector<1x1024xf32>
    %13 = vector.broadcast %12 : vector<1x1024xf32> to vector<8x1024xf32>
    %14 = arith.addf %11, %13 : vector<8x1024xf32>
    %15 = arith.negf %14 : vector<8x1024xf32>
    %16 = math.exp %15 : vector<8x1024xf32>
    %cst_11 = arith.constant 1.000000e+00 : f32
    %17 = vector.broadcast %cst_11 : f32 to vector<8x1024xf32>
    %18 = arith.addf %17, %16 : vector<8x1024xf32>
    %19 = arith.divf %17, %18 : vector<8x1024xf32>
    %c0_12 = arith.constant 0 : index
    %c0_13 = arith.constant 0 : index
    %20 = vector.load %arg6[%c0_12, %c0_13] : memref<8x1024xf32, #tpu.memory_space<vmem>>, vector<8x1024xf32>
    tpu.vector_store %arg6[%c0_12, %c0_13], %19 {strides = array<i32>} : memref<8x1024xf32, #tpu.memory_space<vmem>>, vector<8x1024xf32>,
    return
  }
  func.func @transform_0(%arg0: i32) -> (i32, i32) {
    %c0_i32 = arith.constant 0 : i32
    %c0_i32_0 = arith.constant 0 : i32
    return %arg0, %c0_i32 : i32, i32
  }
  func.func @transform_1(%arg0: i32) -> (i32, i32) {
    %c0_i32 = arith.constant 0 : i32
    %c0_i32_0 = arith.constant 0 : i32
    %c0_i32_1 = arith.constant 0 : i32
    return %c0_i32, %c0_i32_0 : i32, i32
  }
  func.func @transform_2(%arg0: i32) -> (i32, i32) {
    %c0_i32 = arith.constant 0 : i32
    %c0_i32_0 = arith.constant 0 : i32
    %c0_i32_1 = arith.constant 0 : i32
    return %c0_i32, %c0_i32_0 : i32, i32
  }
  func.func @transform_3(%arg0: i32) -> (i32, i32) {
    %c0_i32 = arith.constant 0 : i32
    %c0_i32_0 = arith.constant 0 : i32
    %c0_i32_1 = arith.constant 0 : i32
    return %c0_i32, %c0_i32_0 : i32, i32
  }
  func.func @transform_4(%arg0: i32) -> (i32, i32) {
    %c0_i32 = arith.constant 0 : i32
    %c0_i32_0 = arith.constant 0 : i32
    %c0_i32_1 = arith.constant 0 : i32
    return %c0_i32, %c0_i32_0 : i32, i32
  }
  func.func @transform_5(%arg0: i32) -> (i32, i32) {
    %c0_i32 = arith.constant 0 : i32
    %c0_i32_0 = arith.constant 0 : i32
    return %arg0, %c0_i32 : i32, i32
  }
}

</mosaic_0001>

<bundles_post_ra>
// kernel: tpu_custom_call.1
= control target key start
LH: loop header
LB: loop body
LE: loop exit
PB: predicated region body
PF: predicated region fallthrough
CT: control target
= control target key end

     0   :  { %10 = vsyncpa [#allocation3], 0  ;;  %s2343_s0 = inlined_call_operand.hbm [shape: f32[8,1024], index: 0, kind: input, shape index: {}]   ;;  %s2344_s1 = inlined_call_operand.hbm [shape: bf16[1024,128], index: 1, kind: input, shape index: {}]   ;;  %s2345_s2 = inlined_call_operand.vmem [shape: f32[1,128], index: 2, kind: input, shape index: {}]   ;;  %s2346_s3 = inlined_call_operand.hbm [shape: bf16[128,1024], index: 3, kind: input, shape index: {}]   ;;  %s2347_s4 = inlined_call_operand.hbm [shape: f32[1,1024], index: 4, kind: input, shape index: {}]   ;;  %s2348_s5 = inlined_call_operand.hbm [shape: f32[8,1024], index: 5, kind: output, shape index: {}]  }
   0x1   :  { %11 = vsyncpa [#allocation6], 0 }
   0x2   :  { %12 = vsyncpa [#allocation9], 0  ;;  %s29_s20 = sshll.u32 %s2344_s1, 4  ;;  %s30_s20 = int_to_ptr.hbm [resolvable:$true] %s29_s20 }
   0x3   :  { %13 = vsyncpa [#allocation4], 0  ;;  %s2221_s21 = smov [#allocation5]   ;;  %s19_s25 = sshll.u32 %s2343_s0, 4  ;;  %s20_s25 = int_to_ptr.hbm [resolvable:$true] %s19_s25 }
   0x4   :  { %s31_s22 = sshll.u32 %s2221_s21, 4  ;;  %s2222_s26 = smov 64   ;;  %s32_s22 = int_to_ptr.vmem [resolvable:$true] %s31_s22 }
   0x5   :  { %s2223_s27 = smov 4   ;;  %s2224_s28 = smov [#allocation2]  }
   0x6   :  { %37 = dma.hbm_to_vmem [thread:$0]  %s30_s20, 8192, %s32_s22, [#allocation6], %s2222_s26, %s2222_s26, %s2223_s27  }
   0x7   :  { %s21_s29 = sshll.u32 %s2224_s28, 4  ;;  %s44_s7 = sshll.u32 %s2346_s3, 4  ;;  %s22_s29 = int_to_ptr.vmem [resolvable:$true] %s21_s29  ;;  %s45_s7 = int_to_ptr.hbm [resolvable:$true] %s44_s7 }
   0x8   :  { %24 = dma.hbm_to_vmem [thread:$0]  %s20_s25, 1024, %s22_s29, [#allocation3]  }
   0x9   :  { %s2225_s1 = smov [#allocation7]   ;;  %s58_s0 = sshll.u32 %s2347_s4, 4  ;;  %s59_s0 = int_to_ptr.hbm [resolvable:$true] %s58_s0 }
   0xa   :  { %s46_s8 = sshll.u32 %s2225_s1, 4  ;;  %s2226_s11 = smov 512   ;;  %s47_s8 = int_to_ptr.vmem [resolvable:$true] %s46_s8 }
   0xb   :  { %s2227_s12 = smov 32   ;;  %s2228_s13 = smov [#allocation8]  }
   0xc   :  { %52 = dma.hbm_to_vmem [thread:$0]  %s45_s7, 8192, %s47_s8, [#allocation6], %s2226_s11, %s2226_s11, %s2227_s12  }
   0xd   :  { %s60_s14 = sshll.u32 %s2228_s13, 4  ;;  %s61_s14 = int_to_ptr.vmem [resolvable:$true] %s60_s14 }
   0xe   :  { %63 = dma.hbm_to_vmem [thread:$0]  %s59_s0, 128, %s61_s14, [#allocation9]  }
   0xf   :  { %2213 = dma.done.wait [#allocation3], 1024  }
  0x10   :  { %2214 = vsyncadd [#allocation3], 4294966272 }
  0x11   :  { %2215 = dma.done.wait [#allocation6], 16384  }
  0x12   :  { %2216 = vsyncadd [#allocation6], 4294950912 }
  0x13   :  { %2217 = dma.done.wait [#allocation9], 128  }
  0x14   :  { %2218 = vsyncadd [#allocation9], 4294967168  ;;  %v1930_v0 = vld [vmem:[#allocation5 + $0x38] sm:$0xff]  ;;  %v1929_v4 = vld [vmem:[#allocation5 + $0x30] sm:$0xff]  ;;  %s1391_s18 = sshll.u32 %s2348_s5, 4  ;;  %s1392_s18 = int_to_ptr.hbm [resolvable:$true] %s1391_s18 }
  0x15   :  { %v1938_v1 = vld [vmem:[#allocation5 + $0x78] sm:$0xff]  ;;  %612 = vmatpush.bf16.msra.mxu0 %v1930_v0  ;;  %v1937_v5 = vld [vmem:[#allocation5 + $0x70] sm:$0xff]  ;;  %v1928_v8 = vld [vmem:[#allocation5 + $0x28] sm:$0xff] }
  0x16   :  { %v1946_v2 = vld [vmem:[#allocation5 + $0xb8] sm:$0xff]  ;;  %625 = vmatpush.bf16.msra.mxu1 %v1938_v1  ;;  %v1945_v6 = vld [vmem:[#allocation5 + $0xb0] sm:$0xff]  ;;  %v1936_v9 = vld [vmem:[#allocation5 + $0x68] sm:$0xff] }
  0x17   :  { %v1954_v3 = vld [vmem:[#allocation5 + $0xf8] sm:$0xff]  ;;  %638 = vmatpush.bf16.msra.mxu2 %v1946_v2  ;;  %v1953_v7 = vld [vmem:[#allocation5 + $0xf0] sm:$0xff]  ;;  %v1944_v10 = vld [vmem:[#allocation5 + $0xa8] sm:$0xff] }
  0x18   :  { %651 = vmatpush.bf16.msra.mxu3 %v1954_v3  ;;  %v1952_v11 = vld [vmem:[#allocation5 + $0xe8] sm:$0xff]  ;;  %v1927_v12 = vld [vmem:[#allocation5 + $0x20] sm:$0xff]  ;;  %v1926_v16 = vld [vmem:[#allocation5 + $0x18] sm:$0xff] }
  0x19   :  { %613 = vmatpush.bf16.msra.mxu0 %v1929_v4  ;;  %v1935_v13 = vld [vmem:[#allocation5 + $0x60] sm:$0xff]  ;;  %v1934_v17 = vld [vmem:[#allocation5 + $0x58] sm:$0xff]  ;;  %v1925_v20 = vld [vmem:[#allocation5 + $0x10] sm:$0xff] }
  0x1a   :  { %626 = vmatpush.bf16.msra.mxu1 %v1937_v5  ;;  %v1943_v14 = vld [vmem:[#allocation5 + $0xa0] sm:$0xff]  ;;  %v1942_v18 = vld [vmem:[#allocation5 + $0x98] sm:$0xff]  ;;  %v1933_v21 = vld [vmem:[#allocation5 + $0x50] sm:$0xff] }
  0x1b   :  { %639 = vmatpush.bf16.msra.mxu2 %v1945_v6  ;;  %v1951_v15 = vld [vmem:[#allocation5 + $0xe0] sm:$0xff]  ;;  %v1950_v19 = vld [vmem:[#allocation5 + $0xd8] sm:$0xff]  ;;  %v1941_v22 = vld [vmem:[#allocation5 + $0x90] sm:$0xff] }
  0x1c   :  { %652 = vmatpush.bf16.msra.mxu3 %v1953_v7  ;;  %v1949_v23 = vld [vmem:[#allocation5 + $0xd0] sm:$0xff]  ;;  %v1924_v24 = vld [vmem:[#allocation5 + $0x8] sm:$0xff]  ;;  %v1923_v28 = vld [vmem:[#allocation5] sm:$0xff] }
  0x1d   :  { %614 = vmatpush.bf16.msra.mxu0 %v1928_v8  ;;  %v1932_v25 = vld [vmem:[#allocation5 + $0x48] sm:$0xff]  ;;  %v1931_v29 = vld [vmem:[#allocation5 + $0x40] sm:$0xff]  ;;  %v1962_v32 = vld [vmem:[#allocation5 + $0x138] sm:$0xff] }
  0x1e   :  { %627 = vmatpush.bf16.msra.mxu1 %v1936_v9  ;;  %v1940_v26 = vld [vmem:[#allocation5 + $0x88] sm:$0xff]  ;;  %v1939_v30 = vld [vmem:[#allocation5 + $0x80] sm:$0xff]  ;;  %v82_v33 = vld [vmem:[#allocation2 + $0x10] sm:$0xff] }
  0x1f   :  { %640 = vmatpush.bf16.msra.mxu2 %v1944_v10  ;;  %v1948_v27 = vld [vmem:[#allocation5 + $0xc8] sm:$0xff]  ;;  %v1947_v31 = vld [vmem:[#allocation5 + $0xc0] sm:$0xff]  ;;  %v1970_v35 = vld [vmem:[#allocation5 + $0x178] sm:$0xff]  ;;  %v90_v40 = vpack.c.bf16 %v82_v33, %v82_v33 }
  0x20   :  { %653 = vmatpush.bf16.msra.mxu3 %v1952_v11  ;;  %v80_v34 = vld [vmem:[#allocation2] sm:$0xff]  ;;  %v83_v36 = vld [vmem:[#allocation2 + $0x18] sm:$0xff]  ;;  %v81_v37 = vld [vmem:[#allocation2 + $0x8] sm:$0xff] }
  0x21   :  { %615 = vmatpush.bf16.msra.mxu0 %v1927_v12  ;;  %v1978_v38 = vld [vmem:[#allocation5 + $0x1b8] sm:$0xff]  ;;  %v88_v41 = vpack.c.bf16 %v80_v34, %v80_v34  ;;  %v91_v42 = vpack.c.bf16 %v83_v36, %v83_v36  ;;  %v89_v43 = vpack.c.bf16 %v81_v37, %v81_v37  ;;  %v1961_v44 = vld [vmem:[#allocation5 + $0x130] sm:$0xff]  ;;  %v1960_v48 = vld [vmem:[#allocation5 + $0x128] sm:$0xff] }
  0x22   :  { %628 = vmatpush.bf16.msra.mxu1 %v1935_v13  ;;  %v1986_v39 = vld [vmem:[#allocation5 + $0x1f8] sm:$0xff]  ;;  %v1969_v45 = vld [vmem:[#allocation5 + $0x170] sm:$0xff]  ;;  %v1968_v49 = vld [vmem:[#allocation5 + $0x168] sm:$0xff] }
  0x23   :  { %641 = vmatpush.bf16.msra.mxu2 %v1943_v14  ;;  %v1977_v46 = vld [vmem:[#allocation5 + $0x1b0] sm:$0xff]  ;;  %v1976_v50 = vld [vmem:[#allocation5 + $0x1a8] sm:$0xff]  ;;  %v1959_v52 = vld [vmem:[#allocation5 + $0x120] sm:$0xff] }
  0x24   :  { %654 = vmatpush.bf16.msra.mxu3 %v1951_v15  ;;  %v1985_v47 = vld [vmem:[#allocation5 + $0x1f0] sm:$0xff]  ;;  %v1984_v51 = vld [vmem:[#allocation5 + $0x1e8] sm:$0xff]  ;;  %v1967_v53 = vld [vmem:[#allocation5 + $0x160] sm:$0xff] }
  0x25   :  { %616 = vmatpush.bf16.msra.mxu0 %v1926_v16  ;;  %v1975_v54 = vld [vmem:[#allocation5 + $0x1a0] sm:$0xff]  ;;  %v1958_v56 = vld [vmem:[#allocation5 + $0x118] sm:$0xff]  ;;  %v1957_v60 = vld [vmem:[#allocation5 + $0x110] sm:$0xff] }
  0x26   :  { %629 = vmatpush.bf16.msra.mxu1 %v1934_v17  ;;  %v1983_v55 = vld [vmem:[#allocation5 + $0x1e0] sm:$0xff]  ;;  %v1966_v57 = vld [vmem:[#allocation5 + $0x158] sm:$0xff]  ;;  %v1965_v61 = vld [vmem:[#allocation5 + $0x150] sm:$0xff] }
  0x27   :  { %642 = vmatpush.bf16.msra.mxu2 %v1942_v18  ;;  %v1974_v58 = vld [vmem:[#allocation5 + $0x198] sm:$0xff]  ;;  %v1973_v62 = vld [vmem:[#allocation5 + $0x190] sm:$0xff]  ;;  %v1956_v0 = vld [vmem:[#allocation5 + $0x108] sm:$0xff] }
  0x28   :  { %655 = vmatpush.bf16.msra.mxu3 %v1950_v19  ;;  %v1982_v59 = vld [vmem:[#allocation5 + $0x1d8] sm:$0xff]  ;;  %v1981_v63 = vld [vmem:[#allocation5 + $0x1d0] sm:$0xff]  ;;  %v1964_v1 = vld [vmem:[#allocation5 + $0x148] sm:$0xff] }
  0x29   :  { %617 = vmatpush.bf16.msra.mxu0 %v1925_v20  ;;  %v1972_v2 = vld [vmem:[#allocation5 + $0x188] sm:$0xff]  ;;  %v1955_v4 = vld [vmem:[#allocation5 + $0x100] sm:$0xff]  ;;  %v86_v14 = vld [vmem:[#allocation2 + $0x30] sm:$0xff] }
  0x2a   :  { %630 = vmatpush.bf16.msra.mxu1 %v1933_v21  ;;  %v1980_v3 = vld [vmem:[#allocation5 + $0x1c8] sm:$0xff]  ;;  %v1963_v5 = vld [vmem:[#allocation5 + $0x140] sm:$0xff]  ;;  %v87_v15 = vld [vmem:[#allocation2 + $0x38] sm:$0xff] }
  0x2b   :  { %643 = vmatpush.bf16.msra.mxu2 %v1941_v22  ;;  %v1885_v6 = vld [vmem:[#allocation7 + $0x1c0] sm:$0xf]  ;;  %v2043_v10 = vld [vmem:[#allocation7 + $0x1c4] sm:$0xf]  ;;  %v85_v13 = vld [vmem:[#allocation2 + $0x28] sm:$0xff] }
  0x2c   :  { %656 = vmatpush.bf16.msra.mxu3 %v1949_v23  ;;  %v1971_v7 = vld [vmem:[#allocation5 + $0x180] sm:$0xff]  ;;  %v1893_v16 = vld [vmem:[#allocation7 + $0x1c8] sm:$0xf]  ;;  %v2044_v20 = vld [vmem:[#allocation7 + $0x1cc] sm:$0xf] }
  0x2d   :  { %618 = vmatpush.bf16.msra.mxu0 %v1924_v24  ;;  %v1979_v8 = vld [vmem:[#allocation5 + $0x1c0] sm:$0xff]  ;;  %v2048_v17 = vld [vmem:[#allocation7 + $0x1e4] sm:$0xf0]  ;;  %v1895_v21 = vld [vmem:[#allocation7 + $0x1e8] sm:$0xf0]  ;;  %v93_v24 = vpack.c.bf16 %v85_v13, %v85_v13 }
  0x2e   :  { %631 = vmatpush.bf16.msra.mxu1 %v1932_v25  ;;  %v2047_v9 = vld [vmem:[#allocation7 + $0x1dc] sm:$0xf0]  ;;  %v1887_v11 = vld [vmem:[#allocation7 + $0x1e0] sm:$0xf0]  ;;  %v2036_v36 = vld [vmem:[#allocation7 + $0x18c] sm:$0xf] }
  0x2f   :  { %644 = vmatpush.bf16.msra.mxu2 %v1940_v26  ;;  %v84_v12 = vld [vmem:[#allocation2 + $0x20] sm:$0xff]  ;;  %v1886_v18 = vor.u32 %v2047_v9, %v1885_v6  ;;  %v1890_v19 = vor.u32 %v2043_v10, %v1887_v11  ;;  %v1863_v37 = vld [vmem:[#allocation7 + $0x1a8] sm:$0xf0]  ;;  %v1765_v6 = vld [vmem:[#allocation7 + $0xc8] sm:$0xf] }
  0x30   :  { %657 = vmatpush.bf16.msra.mxu3 %v1948_v27  ;;  %v1853_v22 = vld [vmem:[#allocation7 + $0x180] sm:$0xf]  ;;  %v92_v23 = vpack.c.bf16 %v84_v12, %v84_v12  ;;  %v2035_v26 = vld [vmem:[#allocation7 + $0x184] sm:$0xf]  ;;  %v1767_v10 = vld [vmem:[#allocation7 + $0xe8] sm:$0xf0] }
  0x31   :  { %619 = vmatpush.bf16.msra.mxu0 %v1923_v28  ;;  %v2039_v25 = vld [vmem:[#allocation7 + $0x19c] sm:$0xf0]  ;;  %v1855_v27 = vld [vmem:[#allocation7 + $0x1a0] sm:$0xf0]  ;;  %v94_v28 = vpack.c.bf16 %v86_v14, %v86_v14 }
  0x32   :  { %632 = vmatpush.bf16.msra.mxu1 %v1931_v29  ;;  %v95_v29 = vpack.c.bf16 %v87_v15, %v87_v15  ;;  %v1854_v33 = vor.u32 %v2039_v25, %v1853_v22  ;;  %v1858_v34 = vor.u32 %v2035_v26, %v1855_v27  ;;  %v1725_v12 = vld [vmem:[#allocation7 + $0x80] sm:$0xf]  ;;  %v2003_v14 = vld [vmem:[#allocation7 + $0x84] sm:$0xf]  ;;  %v1735_v22 = vld [vmem:[#allocation7 + $0xa8] sm:$0xf0] }
  0x33   :  { %645 = vmatpush.bf16.msra.mxu2 %v1939_v30  ;;  %v1894_v30 = vor.u32 %v2048_v17, %v1893_v16  ;;  %v2007_v13 = vld [vmem:[#allocation7 + $0x9c] sm:$0xf0]  ;;  %v1727_v16 = vld [vmem:[#allocation7 + $0xa0] sm:$0xf0]  ;;  %v1733_v17 = vld [vmem:[#allocation7 + $0x88] sm:$0xf] }
  0x34   :  { %658 = vmatpush.bf16.msra.mxu3 %v1947_v31  ;;  %620 = vmatmul.bf16.vlgmr.msra.gmra.mxu0 %v88_v41  ;;  %v1898_v31 = vor.u32 %v2044_v20, %v1895_v21  ;;  %v2031_v41 = vld [vmem:[#allocation7 + $0x15c] sm:$0xf0]  ;;  %v1726_v15 = vor.u32 %v2007_v13, %v1725_v12  ;;  %v2004_v21 = vld [vmem:[#allocation7 + $0x8c] sm:$0xf]  ;;  %v1995_v26 = vld [vmem:[#allocation7 + $0x44] sm:$0xf] }
  0x35   :  { %664 = vmatpush.bf16.msrb.mxu0 %v1962_v32  ;;  %633 = vmatmul.bf16.vlgmr.msra.gmra.mxu1 %v89_v43  ;;  %v1861_v32 = vld [vmem:[#allocation7 + $0x188] sm:$0xf]  ;;  %v1999_v25 = vld [vmem:[#allocation7 + $0x5c] sm:$0xf0]  ;;  %v1695_v27 = vld [vmem:[#allocation7 + $0x60] sm:$0xf0] }
  0x36   :  { %677 = vmatpush.bf16.msrb.mxu1 %v1970_v35  ;;  %646 = vmatmul.bf16.vlgmr.msra.gmra.mxu2 %v90_v40  ;;  %v2040_v35 = vld [vmem:[#allocation7 + $0x1a4] sm:$0xf0]  ;;  %v1821_v40 = vld [vmem:[#allocation7 + $0x140] sm:$0xf]  ;;  %v2029_v12 = vld [vmem:[#allocation7 + $0x154] sm:$0xf] }
  0x37   :  { %690 = vmatpush.bf16.msrb.mxu2 %v1978_v38  ;;  %659 = vmatmul.bf16.vlgmr.msra.gmra.mxu3 %v91_v42  ;;  %v1862_v38 = vor.u32 %v2040_v35, %v1861_v32  ;;  %v2027_v42 = vld [vmem:[#allocation7 + $0x144] sm:$0xf]  ;;  %v1822_v43 = vor.u32 %v2031_v41, %v1821_v40  ;;  %v1698_v32 = vor.u32 %v1995_v26, %v1695_v27  ;;  %v1661_v35 = vld [vmem:[#allocation7] sm:$0xf]  ;;  %v1669_v40 = vld [vmem:[#allocation7 + $0x8] sm:$0xf] }
  0x38   :  { %703 = vmatpush.bf16.msrb.mxu3 %v1986_v39  ;;  %v1866_v39 = vor.u32 %v2036_v36, %v1863_v37  ;;  %v1991_v36 = vld [vmem:[#allocation7 + $0x1c] sm:$0xf0]  ;;  %v1992_v41 = vld [vmem:[#allocation7 + $0x24] sm:$0xf0]  ;;  %v2021_v26 = vld [vmem:[#allocation7 + $0x114] sm:$0xf] }
  0x39   :  { %665 = vmatpush.bf16.msrb.mxu0 %v1961_v44  ;;  %v1823_v44 = vld [vmem:[#allocation7 + $0x160] sm:$0xf0] }
  0x3a   :  { %678 = vmatpush.bf16.msrb.mxu1 %v1969_v45  ;;  %v1829_v45 = vld [vmem:[#allocation7 + $0x148] sm:$0xf] }
  0x3b   :  { %691 = vmatpush.bf16.msrb.mxu2 %v1977_v46  ;;  %v2032_v46 = vld [vmem:[#allocation7 + $0x164] sm:$0xf0] }
  0x3c   :  { %704 = vmatpush.bf16.msrb.mxu3 %v1985_v47  ;;  %v1826_v47 = vor.u32 %v2027_v42, %v1823_v44  ;;  %v1988_v42 = vld [vmem:[#allocation7 + $0xc] sm:$0xf]  ;;  %v1662_v44 = vor.u32 %v1991_v36, %v1661_v35  ;;  %v2022_v35 = vld [vmem:[#allocation7 + $0x11c] sm:$0xf] }
  0x3d   :  { %666 = vmatpush.bf16.msrb.mxu0 %v1960_v48  ;;  %v1830_v48 = vor.u32 %v2032_v46, %v1829_v45  ;;  %v1670_v46 = vor.u32 %v1992_v41, %v1669_v40  ;;  %v1815_v36 = vld [vmem:[#allocation7 + $0x138] sm:$0xf0]  ;;  %v2017_v40 = vld [vmem:[#allocation7 + $0xec] sm:$0xf0]  ;;  %v2013_v41 = vld [vmem:[#allocation7 + $0xd4] sm:$0xf] }
  0x3e   :  { %679 = vmatpush.bf16.msrb.mxu1 %v1968_v49  ;;  %v2028_v49 = vld [vmem:[#allocation7 + $0x14c] sm:$0xf] }
  0x3f   :  { %692 = vmatpush.bf16.msrb.mxu2 %v1976_v50  ;;  %v1831_v50 = vld [vmem:[#allocation7 + $0x168] sm:$0xf0] }
  0x40   :  { %705 = vmatpush.bf16.msrb.mxu3 %v1984_v51  ;;  %v1834_v51 = vor.u32 %v2028_v49, %v1831_v50  ;;  %v2049_v49 = vld [vmem:[#allocation7 + $0x1ec] sm:$0xf0]  ;;  %v2045_v50 = vld [vmem:[#allocation7 + $0x1d4] sm:$0xf] }
  0x41   :  { %667 = vmatpush.bf16.msrb.mxu0 %v1959_v52  ;;  %v1789_v52 = vld [vmem:[#allocation7 + $0x100] sm:$0xf] }
  0x42   :  { %680 = vmatpush.bf16.msrb.mxu1 %v1967_v53  ;;  %v2023_v53 = vld [vmem:[#allocation7 + $0x11c] sm:$0xf0] }
  0x43   :  { %693 = vmatpush.bf16.msrb.mxu2 %v1975_v54  ;;  %v2019_v54 = vld [vmem:[#allocation7 + $0x104] sm:$0xf] }
  0x44   :  { %706 = vmatpush.bf16.msrb.mxu3 %v1983_v55  ;;  %v1790_v55 = vor.u32 %v2023_v53, %v1789_v52  ;;  %v1903_v52 = vld [vmem:[#allocation7 + $0x1f0] sm:$0xf0]  ;;  %v1909_v53 = vld [vmem:[#allocation7 + $0x1d8] sm:$0xf] }
  0x45   :  { %668 = vmatpush.bf16.msrb.mxu0 %v1958_v56  ;;  %v1791_v56 = vld [vmem:[#allocation7 + $0x120] sm:$0xf0] }
  0x46   :  { %681 = vmatpush.bf16.msrb.mxu1 %v1966_v57  ;;  %v1797_v57 = vld [vmem:[#allocation7 + $0x108] sm:$0xf] }
  0x47   :  { %694 = vmatpush.bf16.msrb.mxu2 %v1974_v58  ;;  %v2024_v58 = vld [vmem:[#allocation7 + $0x124] sm:$0xf0] }
  0x48   :  { %707 = vmatpush.bf16.msrb.mxu3 %v1982_v59  ;;  %v1794_v59 = vor.u32 %v2019_v54, %v1791_v56  ;;  %v2050_v54 = vld [vmem:[#allocation7 + $0x1f4] sm:$0xf0] }
  0x49   :  { %669 = vmatpush.bf16.msrb.mxu0 %v1957_v60  ;;  %v1798_v60 = vor.u32 %v2024_v58, %v1797_v57  ;;  %v1910_v56 = vor.u32 %v2050_v54, %v1909_v53  ;;  %v2046_v57 = vld [vmem:[#allocation7 + $0x1dc] sm:$0xf]  ;;  %v2009_v54 = vld [vmem:[#allocation7 + $0xac] sm:$0xf0] }
  0x4a   :  { %682 = vmatpush.bf16.msrb.mxu1 %v1965_v61  ;;  %v2020_v61 = vld [vmem:[#allocation7 + $0x10c] sm:$0xf]  ;;  %v1911_v58 = vld [vmem:[#allocation7 + $0x1f8] sm:$0xf0] }
  0x4b   :  { %695 = vmatpush.bf16.msrb.mxu2 %v1973_v62  ;;  %v1799_v62 = vld [vmem:[#allocation7 + $0x128] sm:$0xf0] }
  0x4c   :  { %708 = vmatpush.bf16.msrb.mxu3 %v1981_v63  ;;  %v1757_v63 = vld [vmem:[#allocation7 + $0xc0] sm:$0xf] }
  0x4d   :  { %670 = vmatpush.bf16.msrb.mxu0 %v1956_v0  ;;  %v1802_v0 = vor.u32 %v2020_v61, %v1799_v62  ;;  %v2041_v61 = vld [vmem:[#allocation7 + $0x1ac] sm:$0xf0]  ;;  %v2037_v62 = vld [vmem:[#allocation7 + $0x194] sm:$0xf] }
  0x4e   :  { %683 = vmatpush.bf16.msrb.mxu1 %v1964_v1  ;;  %v2015_v1 = vld [vmem:[#allocation7 + $0xdc] sm:$0xf0] }
  0x4f   :  { %696 = vmatpush.bf16.msrb.mxu2 %v1972_v2  ;;  %v2011_v2 = vld [vmem:[#allocation7 + $0xc4] sm:$0xf] }
  0x50   :  { %709 = vmatpush.bf16.msrb.mxu3 %v1980_v3  ;;  %v1759_v3 = vld [vmem:[#allocation7 + $0xe0] sm:$0xf0] }
  0x51   :  { %671 = vmatpush.bf16.msrb.mxu0 %v1955_v4  ;;  %v1758_v4 = vor.u32 %v2015_v1, %v1757_v63  ;;  %v1871_v1 = vld [vmem:[#allocation7 + $0x1b0] sm:$0xf0] }
  0x52   :  { %684 = vmatpush.bf16.msrb.mxu1 %v1963_v5  ;;  %v1762_v5 = vor.u32 %v2011_v2, %v1759_v3  ;;  %v1877_v2 = vld [vmem:[#allocation7 + $0x198] sm:$0xf] }
  0x53   :  { %697 = vmatpush.bf16.msrb.mxu2 %v1971_v7  ;;  %v2016_v7 = vld [vmem:[#allocation7 + $0xe4] sm:$0xf0]  ;;  %v2042_v3 = vld [vmem:[#allocation7 + $0x1b4] sm:$0xf0] }
  0x54   :  { %710 = vmatpush.bf16.msrb.mxu3 %v1979_v8  ;;  %672 = vmatmul.bf16.vlgmr.msrb.gmra.mxu0 %v92_v23  ;;  %v2012_v8 = vld [vmem:[#allocation7 + $0xcc] sm:$0xf]  ;;  %v1766_v9 = vor.u32 %v2016_v7, %v1765_v6  ;;  %v1693_v23 = vld [vmem:[#allocation7 + $0x40] sm:$0xf]  ;;  %v1878_v6 = vor.u32 %v2042_v3, %v1877_v2  ;;  %v2038_v7 = vld [vmem:[#allocation7 + $0x19c] sm:$0xf] }
  0x55   :  { %1120 = vmatpush.bf16.msra.mxu0 %v1886_v18  ;;  %685 = vmatmul.bf16.vlgmr.msrb.gmra.mxu1 %v93_v24  ;;  %v1770_v11 = vor.u32 %v2012_v8, %v1767_v10  ;;  %v2008_v18 = vld [vmem:[#allocation7 + $0xa4] sm:$0xf0]  ;;  %v1738_v24 = vor.u32 %v2004_v21, %v1735_v22  ;;  %v1879_v8 = vld [vmem:[#allocation7 + $0x1b8] sm:$0xf0]  ;;  %v1837_v10 = vld [vmem:[#allocation7 + $0x150] sm:$0xf] }
  0x56   :  { %1133 = vmatpush.bf16.msra.mxu1 %v1890_v19  ;;  %698 = vmatmul.bf16.vlgmr.msrb.gmra.mxu2 %v94_v28  ;;  %v1730_v19 = vor.u32 %v2003_v14, %v1727_v16  ;;  %v1734_v20 = vor.u32 %v2008_v18, %v1733_v17  ;;  %v1694_v28 = vor.u32 %v1999_v25, %v1693_v23  ;;  %v1839_v14 = vld [vmem:[#allocation7 + $0x170] sm:$0xf0]  ;;  %v2034_v16 = vld [vmem:[#allocation7 + $0x174] sm:$0xf0]  ;;  %v2025_v25 = vld [vmem:[#allocation7 + $0x12c] sm:$0xf0] }
  0x57   :  { %711 = vmatmul.bf16.vlgmr.msrb.gmra.mxu3 %v95_v29  ;;  %1146 = vmatpush.bf16.msra.mxu2 %v1894_v30  ;;  %v1701_v29 = vld [vmem:[#allocation7 + $0x48] sm:$0xf]  ;;  %v1842_v17 = vor.u32 %v2029_v12, %v1839_v14  ;;  %v1709_v2 = vld [vmem:[#allocation7 + $0x50] sm:$0xf]  ;;  %v1719_v12 = vld [vmem:[#allocation7 + $0x78] sm:$0xf0] }
  0x58   :  { %1159 = vmatpush.bf16.msra.mxu3 %v1898_v31  ;;  %v2000_v30 = vld [vmem:[#allocation7 + $0x64] sm:$0xf0]  ;;  %v1996_v31 = vld [vmem:[#allocation7 + $0x4c] sm:$0xf]  ;;  %v2001_v3 = vld [vmem:[#allocation7 + $0x6c] sm:$0xf0] }
  0x59   :  { %1121 = vmatpush.bf16.msra.mxu0 %v1854_v33  ;;  %v1702_v33 = vor.u32 %v2000_v30, %v1701_v29  ;;  %v1807_v29 = vld [vmem:[#allocation7 + $0x130] sm:$0xf0]  ;;  %v1813_v30 = vld [vmem:[#allocation7 + $0x118] sm:$0xf] }
  0x5a   :  { %1134 = vmatpush.bf16.msra.mxu1 %v1858_v34  ;;  %v1703_v34 = vld [vmem:[#allocation7 + $0x68] sm:$0xf0] }
  0x5b   :  { %1147 = vmatpush.bf16.msra.mxu2 %v1862_v38  ;;  %v1706_v37 = vor.u32 %v1996_v31, %v1703_v34  ;;  %v1987_v38 = vld [vmem:[#allocation7 + $0x4] sm:$0xf]  ;;  %v2026_v31 = vld [vmem:[#allocation7 + $0x134] sm:$0xf0] }
  0x5c   :  { %1160 = vmatpush.bf16.msra.mxu3 %v1866_v39  ;;  %v1663_v39 = vld [vmem:[#allocation7 + $0x20] sm:$0xf0]  ;;  %v1814_v34 = vor.u32 %v2026_v31, %v1813_v30 }
  0x5d   :  { %1122 = vmatpush.bf16.msra.mxu0 %v1822_v43  ;;  %v1671_v43 = vld [vmem:[#allocation7 + $0x28] sm:$0xf0]  ;;  %v1666_v45 = vor.u32 %v1987_v38, %v1663_v39  ;;  %v2060_v38 = vld [vmem:[%s2345_s2] ss:$0 sm:$0xff]  ;;  %v1773_v39 = vld [vmem:[#allocation7 + $0xd0] sm:$0xf] }
  0x5e   :  { %1135 = vmatpush.bf16.msra.mxu1 %v1826_v47  ;;  %v1674_v47 = vor.u32 %v1988_v42, %v1671_v43  ;;  %v1774_v42 = vor.u32 %v2017_v40, %v1773_v39  ;;  %v1775_v43 = vld [vmem:[#allocation7 + $0xf0] sm:$0xf0]  ;;  %s2229_s2 = smov [#allocation10]  }
  0x5f   :  { %1148 = vmatpush.bf16.msra.mxu2 %v1830_v48  ;;  %v1901_v48 = vld [vmem:[#allocation7 + $0x1d0] sm:$0xf]  ;;  %s1389_s15 = sshll.u32 %s2229_s2, 4  ;;  %s1390_s15 = int_to_ptr.vmem [resolvable:$true] %s1389_s15 }
  0x60   :  { %1161 = vmatpush.bf16.msra.mxu3 %v1834_v51  ;;  %v1902_v51 = vor.u32 %v2049_v49, %v1901_v48  ;;  %v2014_v49 = vld [vmem:[#allocation7 + $0xdc] sm:$0xf] }
  0x61   :  { %1123 = vmatpush.bf16.msra.mxu0 %v1790_v55  ;;  %v1906_v55 = vor.u32 %v2045_v50, %v1903_v52  ;;  %v1783_v50 = vld [vmem:[#allocation7 + $0xf8] sm:$0xf0] }
  0x62   :  { %1136 = vmatpush.bf16.msra.mxu1 %v1794_v59  ;;  %v1914_v59 = vor.u32 %v2046_v57, %v1911_v58  ;;  %v1786_v53 = vor.u32 %v2014_v49, %v1783_v50 }
  0x63   :  { %1149 = vmatpush.bf16.msra.mxu2 %v1798_v60  ;;  %v1869_v60 = vld [vmem:[#allocation7 + $0x190] sm:$0xf] }
  0x64   :  { %1162 = vmatpush.bf16.msra.mxu3 %v1802_v0  ;;  %v1870_v0 = vor.u32 %v2041_v61, %v1869_v60  ;;  %v2010_v60 = vld [vmem:[#allocation7 + $0xb4] sm:$0xf0]  ;;  %v2006_v61 = vld [vmem:[#allocation7 + $0x9c] sm:$0xf] }
  0x65   :  { %1124 = vmatpush.bf16.msra.mxu0 %v1758_v4 }
  0x66   :  { %1137 = vmatpush.bf16.msra.mxu1 %v1762_v5  ;;  %v1874_v5 = vor.u32 %v2037_v62, %v1871_v1  ;;  %v1751_v1 = vld [vmem:[#allocation7 + $0xb8] sm:$0xf0] }
  0x67   :  { %1150 = vmatpush.bf16.msra.mxu2 %v1766_v9  ;;  %v1882_v9 = vor.u32 %v2038_v7, %v1879_v8  ;;  %v1711_v7 = vld [vmem:[#allocation7 + $0x70] sm:$0xf0]  ;;  %v1717_v8 = vld [vmem:[#allocation7 + $0x58] sm:$0xf] }
  0x68   :  { %1163 = vmatpush.bf16.msra.mxu3 %v1770_v11  ;;  %v2033_v11 = vld [vmem:[#allocation7 + $0x16c] sm:$0xf0] }
  0x69   :  { %1125 = vmatpush.bf16.msra.mxu0 %v1726_v15  ;;  %v1838_v13 = vor.u32 %v2033_v11, %v1837_v10  ;;  %v1845_v15 = vld [vmem:[#allocation7 + $0x158] sm:$0xf]  ;;  %v1998_v11 = vld [vmem:[#allocation7 + $0x5c] sm:$0xf] }
  0x6a   :  { %1138 = vmatpush.bf16.msra.mxu1 %v1730_v19  ;;  %v1846_v18 = vor.u32 %v2034_v16, %v1845_v15  ;;  %v2030_v19 = vld [vmem:[#allocation7 + $0x15c] sm:$0xf]  ;;  %v2002_v10 = vld [vmem:[#allocation7 + $0x74] sm:$0xf0]  ;;  %v1677_v15 = vld [vmem:[#allocation7 + $0x10] sm:$0xf] }
  0x6b   :  { %1151 = vmatpush.bf16.msra.mxu2 %v1734_v20  ;;  %v1847_v20 = vld [vmem:[#allocation7 + $0x178] sm:$0xf0]  ;;  %v1718_v14 = vor.u32 %v2002_v10, %v1717_v8  ;;  %v1989_v16 = vld [vmem:[#allocation7 + $0x14] sm:$0xf] }
  0x6c   :  { %1164 = vmatpush.bf16.msra.mxu3 %v1738_v24  ;;  %v1850_v22 = vor.u32 %v2030_v19, %v1847_v20  ;;  %v1805_v24 = vld [vmem:[#allocation7 + $0x110] sm:$0xf]  ;;  %v1679_v19 = vld [vmem:[#allocation7 + $0x30] sm:$0xf0]  ;;  %v1685_v20 = vld [vmem:[#allocation7 + $0x18] sm:$0xf] }
  0x6d   :  { %1126 = vmatpush.bf16.msra.mxu0 %v1694_v28  ;;  %v1806_v28 = vor.u32 %v2025_v25, %v1805_v24  ;;  %v1990_v24 = vld [vmem:[#allocation7 + $0x1c] sm:$0xf] }
  0x6e   :  { %1139 = vmatpush.bf16.msra.mxu1 %v1698_v32  ;;  %v1687_v25 = vld [vmem:[#allocation7 + $0x38] sm:$0xf0] }
  0x6f   :  { %1152 = vmatpush.bf16.msra.mxu2 %v1702_v33  ;;  %v1810_v33 = vor.u32 %v2021_v26, %v1807_v29  ;;  %v1690_v30 = vor.u32 %v1990_v24, %v1687_v25 }
  0x70   :  { %1165 = vmatpush.bf16.msra.mxu3 %v1706_v37  ;;  %v1818_v37 = vor.u32 %v2022_v35, %v1815_v36 }
  0x71   :  { %1127 = vmatpush.bf16.msra.mxu0 %v1662_v44  ;;  %v1781_v44 = vld [vmem:[#allocation7 + $0xd8] sm:$0xf] }
  0x72   :  { %1140 = vmatpush.bf16.msra.mxu1 %v1666_v45  ;;  %v2018_v45 = vld [vmem:[#allocation7 + $0xf4] sm:$0xf0] }
  0x73   :  { %1153 = vmatpush.bf16.msra.mxu2 %v1670_v46  ;;  %v1782_v48 = vor.u32 %v2018_v45, %v1781_v44 }
  0x74   :  { %1166 = vmatpush.bf16.msra.mxu3 %v1674_v47  ;;  %v1778_v47 = vor.u32 %v2013_v41, %v1775_v43 }
  0x75   :  { %1172 = vmatpush.bf16.msrb.mxu0 %v1902_v51  ;;  %v1741_v51 = vld [vmem:[#allocation7 + $0x90] sm:$0xf] }
  0x76   :  { %1185 = vmatpush.bf16.msrb.mxu1 %v1906_v55  ;;  %v2005_v55 = vld [vmem:[#allocation7 + $0x94] sm:$0xf]  ;;  %v1742_v57 = vor.u32 %v2009_v54, %v1741_v51 }
  0x77   :  { %1198 = vmatpush.bf16.msrb.mxu2 %v1910_v56  ;;  %v1743_v56 = vld [vmem:[#allocation7 + $0xb0] sm:$0xf0] }
  0x78   :  { %1211 = vmatpush.bf16.msrb.mxu3 %v1914_v59  ;;  %v1746_v58 = vor.u32 %v2005_v55, %v1743_v56  ;;  %v1749_v59 = vld [vmem:[#allocation7 + $0x98] sm:$0xf] }
  0x79   :  { %1173 = vmatpush.bf16.msrb.mxu0 %v1870_v0  ;;  %v1750_v0 = vor.u32 %v2010_v60, %v1749_v59 }
  0x7a   :  { %1186 = vmatpush.bf16.msrb.mxu1 %v1874_v5  ;;  %v1754_v5 = vor.u32 %v2006_v61, %v1751_v1 }
  0x7b   :  { %1199 = vmatpush.bf16.msrb.mxu2 %v1878_v6  ;;  %v1997_v6 = vld [vmem:[#allocation7 + $0x54] sm:$0xf] }
  0x7c   :  { %1212 = vmatpush.bf16.msrb.mxu3 %v1882_v9  ;;  %v1710_v9 = vor.u32 %v2001_v3, %v1709_v2 }
  0x7d   :  { %1174 = vmatpush.bf16.msrb.mxu0 %v1838_v13  ;;  %v1714_v13 = vor.u32 %v1997_v6, %v1711_v7 }
  0x7e   :  { %1187 = vmatpush.bf16.msrb.mxu1 %v1842_v17 }
  0x7f   :  { %1200 = vmatpush.bf16.msrb.mxu2 %v1846_v18  ;;  %v1722_v18 = vor.u32 %v1998_v11, %v1719_v12 }
  0x80   :  { %1213 = vmatpush.bf16.msrb.mxu3 %v1850_v22  ;;  %v1994_v22 = vld [vmem:[#allocation7 + $0x34] sm:$0xf0] }
  0x81   :  { %1175 = vmatpush.bf16.msrb.mxu0 %v1806_v28  ;;  %v1686_v28 = vor.u32 %v1994_v22, %v1685_v20 }
  0x82   :  { %1188 = vmatpush.bf16.msrb.mxu1 %v1810_v33 }
  0x83   :  { %1201 = vmatpush.bf16.msrb.mxu2 %v1814_v34 }
  0x84   :  { %1214 = vmatpush.bf16.msrb.mxu3 %v1818_v37 }
  0x85   :  { %1176 = vmatpush.bf16.msrb.mxu0 %v1774_v42 }
  0x86   :  { %1189 = vmatpush.bf16.msrb.mxu1 %v1778_v47 }
  0x87   :  { %1202 = vmatpush.bf16.msrb.mxu2 %v1782_v48 }
  0x88   :  { %1215 = vmatpush.bf16.msrb.mxu3 %v1786_v53 }
  0x89   :  { %1177 = vmatpush.bf16.msrb.mxu0 %v1742_v57 }
  0x8a   :  { %1190 = vmatpush.bf16.msrb.mxu1 %v1746_v58 }
  0x8b   :  { %1203 = vmatpush.bf16.msrb.mxu2 %v1750_v0 }
  0x8c   :  { %1216 = vmatpush.bf16.msrb.mxu3 %v1754_v5 }
  0x8d   :  { %1178 = vmatpush.bf16.msrb.mxu0 %v1710_v9 }
  0x8e   :  { %1191 = vmatpush.bf16.msrb.mxu1 %v1714_v13 }
  0x8f   :  { %1204 = vmatpush.bf16.msrb.mxu2 %v1718_v14 }
  0x90   :  { %1217 = vmatpush.bf16.msrb.mxu3 %v1722_v18 }
  0x93   :  { %1205 = vmatpush.bf16.msrb.mxu2 %v1686_v28 }
  0x94   :  { %1218 = vmatpush.bf16.msrb.mxu3 %v1690_v30 }
  0xb1   :  { %v2272_v63 = vpop.f32.mrf.mxu0 }
  0xb2   :  { %v2274_v4 = vpop.f32.mrf.mxu1  ;;  %v622_v62 = vadd.f32 %v2060_v38, %v2272_v63  ;;  %v1993_v63 = vld [vmem:[#allocation7 + $0x2c] sm:$0xf0] }
  0xb3   :  { %v1678_v26 = vor.u32 %v1993_v63, %v1677_v15 }
  0xb4   :  { %v635_v17 = vadd.f32 %v2274_v4, %v622_v62 }
  0xb5   :  { %1179 = vmatpush.bf16.msrb.mxu0 %v1678_v26 }
  0xb9   :  { %v2276_v21 = vpop.f32.mrf.mxu2  ;;  %v623_v27 = vpop.f32.mrf.mxu0 }
  0xba   :  { %v2278_v23 = vpop.f32.mrf.mxu3  ;;  %v636_v32 = vpop.f32.mrf.mxu1  ;;  %v1682_v27 = vor.u32 %v1989_v16, %v1679_v19  ;;  %v648_v29 = vadd.f32 %v2276_v21, %v635_v17 }
  0xbc   :  { %1192 = vmatpush.bf16.msrb.mxu1 %v1682_v27  ;;  %v661_v4 = vadd.f32 %v2278_v23, %v648_v29  ;;  %v2287_v23 = vld [vmem:[#allocation8] sm:$0xff] }
  0xbd   :  { %v784_v44 = vperm.slane %v2287_v23, 0  ;;  %v785_v45 = vperm.slane %v2287_v23, 1  ;;  %v787_v53 = vperm.slane %v2287_v23, 3  ;;  %v788_v3 = vperm.slane %v2287_v23, 4 }
  0xbe   :  { %v789_v5 = vperm.slane %v2287_v23, 5  ;;  %v790_v19 = vperm.slane %v2287_v23, 6  ;;  %v791_v24 = vperm.slane %v2287_v23, 7 }
  0xc1   :  { %v649_v46 = vpop.f32.mrf.mxu2 }
  0xc2   :  { %v662_v52 = vpop.f32.mrf.mxu3 }
  0xc3   :  { %v786_v52 = vperm.slane %v2287_v23, 2 }
  0xd1   :  { %v673_v31 = vpop.f32.mrf.mxu0 }
  0xd2   :  { %v686_v32 = vpop.f32.mrf.mxu1  ;;  %v674_v33 = vadd.f32 %v673_v31, %v661_v4 }
  0xd4   :  { %v687_v34 = vadd.f32 %v686_v32, %v674_v33 }
  0xd9   :  { %v699_v35 = vpop.f32.mrf.mxu2  ;;  %v675_v38 = vpop.f32.mrf.mxu0 }
  0xda   :  { %v712_v36 = vpop.f32.mrf.mxu3  ;;  %v700_v37 = vadd.f32 %v699_v35, %v687_v34  ;;  %v688_v39 = vpop.f32.mrf.mxu1 }
  0xdc   :  { %v713_v40 = vadd.f32 %v712_v36, %v700_v37 }
  0xde   :  { %v716_v41 = vmax.f32 %v713_v40, 0.0 }
  0xe0   :  { %v717_v21 = vpack.c.bf16 %v716_v41, %v716_v41 }
  0xe1   :  { %v701_v42 = vpop.f32.mrf.mxu2 }
  0xe2   :  { %v714_v43 = vpop.f32.mrf.mxu3  ;;  %1128 = vmatmul.bf16.vlgmr.msra.gmra.mxu0 %v717_v21  ;;  %1141 = vmatmul.bf16.vlgmr.msra.gmra.mxu1 %v717_v21 }
  0xe3   :  { %1154 = vmatmul.bf16.vlgmr.msra.gmra.mxu2 %v717_v21  ;;  %1167 = vmatmul.bf16.vlgmr.msra.gmra.mxu3 %v717_v21 }
  0xf2   :  { %1180 = vmatmul.bf16.vlgmr.msrb.gmra.mxu0 %v717_v21  ;;  %1193 = vmatmul.bf16.vlgmr.msrb.gmra.mxu1 %v717_v21 }
  0xf3   :  { %1206 = vmatmul.bf16.vlgmr.msrb.gmra.mxu2 %v717_v21  ;;  %1219 = vmatmul.bf16.vlgmr.msrb.gmra.mxu3 %v717_v21 }
 0x15f   :  { %v1129_v46 = vpop.f32.mrf.mxu0  ;;  %v1142_v47 = vpop.f32.mrf.mxu1 }
 0x160   :  { %v1130_v48 = vadd.f32 %v1129_v46, %v784_v44  ;;  %v1143_v49 = vadd.f32 %v1142_v47, %v785_v45 }
 0x162   :  { %v1915_v50 = vmul.f32 -1.442695, %v1130_v48  ;;  %v1916_v51 = vmul.f32 -1.442695, %v1143_v49 }
 0x164   :  { %2061 = vpow2.f32 %v1915_v50 }
 0x165   :  { %2063 = vpow2.f32 %v1916_v51 }
 0x166   :  { %v1155_v54 = vpop.f32.mrf.mxu2  ;;  %v1168_v55 = vpop.f32.mrf.mxu3 }
 0x167   :  { %v1156_v56 = vadd.f32 %v1155_v54, %v786_v52  ;;  %v1169_v57 = vadd.f32 %v1168_v55, %v787_v53  ;;  %v1131_v58 = vpop.f32.mrf.mxu0  ;;  %v1144_v59 = vpop.f32.mrf.mxu1 }
 0x169   :  { %v1917_v60 = vmul.f32 -1.442695, %v1156_v56  ;;  %v1918_v61 = vmul.f32 -1.442695, %v1169_v57 }
 0x16a   :  { %v2062_v62 = vpop.eup %2061 }
 0x16b   :  { %v2064_v0 = vpop.eup %2063  ;;  %v1248_v1 = vadd.f32 1.0, %v2062_v62  ;;  %2065 = vpow2.f32 %v1917_v60 }
 0x16c   :  { %v1249_v2 = vadd.f32 1.0, %v2064_v0  ;;  %2067 = vpow2.f32 %v1918_v61 }
 0x16d   :  { %2069 = vrcp.f32 %v1248_v1  ;;  %vm1261_vm0 = vweird.f32 %v1248_v1  ;;  %v1265_v26 = vand.u32 2147483647, %v1248_v1  ;;  %v1267_v29 = vand.u32 2147483648, %v1248_v1 }
 0x16e   :  { %2071 = vrcp.f32 %v1249_v2  ;;  %v1157_v6 = vpop.f32.mrf.mxu2  ;;  %v1170_v7 = vpop.f32.mrf.mxu3  ;;  %v1280_v4 = vand.u32 2147483647, %v1249_v2  ;;  %v1282_v31 = vand.u32 2147483648, %v1249_v2  ;;  %vm1276_vm4 = vweird.f32 %v1249_v2 }
 0x16f   :  { %v1181_v8 = vpop.f32.mrf.mxu0  ;;  %v1194_v9 = vpop.f32.mrf.mxu1  ;;  %vm1266_vm3 = vcmp.eq.f32.partialorder %v1265_v26, 8.507059e+37  ;;  %v1268_v41 = vor.u32 1.1754944e-38, %v1267_v29 }
 0x170   :  { %v1182_v10 = vadd.f32 %v1181_v8, %v788_v3  ;;  %v1195_v12 = vadd.f32 %v1194_v9, %v789_v5  ;;  %vm1281_vm7 = vcmp.eq.f32.partialorder %v1280_v4, 8.507059e+37  ;;  %v1283_v45 = vor.u32 1.1754944e-38, %v1282_v31 }
 0x171   :  { %v2066_v11 = vpop.eup %2065 }
 0x172   :  { %v2068_v13 = vpop.eup %2067  ;;  %v2295_v14 = vadd.f32 1.0, %v2066_v11  ;;  %v1919_v18 = vmul.f32 -1.442695, %v1182_v10  ;;  %v1920_v22 = vmul.f32 -1.442695, %v1195_v12 }
 0x173   :  { %v2070_v15 = vpop.eup %2069  ;;  %v2297_v63 = vadd.f32 1.0, %v2068_v13 }
 0x174   :  { %v2072_v16 = vpop.eup %2071  ;;  %v1257_v17 = vmul.f32 %v2070_v15, %v1248_v1  ;;  %2073 = vrcp.f32 %v2295_v14  ;;  %vm1262_vm1 = vweird.f32 %v2070_v15  ;;  %v1295_v52 = vand.u32 2147483647, %v2295_v14 }
 0x175   :  { %v1272_v20 = vmul.f32 %v2072_v16, %v1249_v2  ;;  %2075 = vrcp.f32 %v2297_v63  ;;  %vm1277_vm2 = vweird.f32 %v2072_v16  ;;  %vm1263_vm5 = vmor %vm1261_vm0, %vm1262_vm1  ;;  %v1297_v53 = vand.u32 2147483648, %v2295_v14 }
 0x176   :  { %v1258_v25 = vsub.f32 1.0, %v1257_v17  ;;  %v1207_v27 = vpop.f32.mrf.mxu2  ;;  %v1220_v28 = vpop.f32.mrf.mxu3  ;;  %2077 = vpow2.f32 %v1919_v18  ;;  %vm1278_vm6 = vmor %vm1276_vm4, %vm1277_vm2  ;;  %vm1291_vm9 = vweird.f32 %v2295_v14  ;;  %v1310_v60 = vand.u32 2147483647, %v2297_v63 }
 0x177   :  { %v1273_v30 = vsub.f32 1.0, %v1272_v20  ;;  %v1183_v32 = vpop.f32.mrf.mxu0  ;;  %v1196_v33 = vpop.f32.mrf.mxu1  ;;  %v1208_v35 = vadd.f32 %v1207_v27, %v790_v19  ;;  %2079 = vpow2.f32 %v1920_v22  ;;  %v1221_v37 = vadd.f32 %v1220_v28, %v791_v24 }
 0x178   :  { %v1259_v34 = vmul.f32 %v2070_v15, %v1258_v25  ;;  %v1312_v61 = vand.u32 2147483648, %v2297_v63  ;;  %v1298_v3 = vor.u32 1.1754944e-38, %v1297_v53  ;;  %vm1296_vm12 = vcmp.eq.f32.partialorder %v1295_v52, 8.507059e+37 }
 0x179   :  { %v1274_v36 = vmul.f32 %v2072_v16, %v1273_v30  ;;  %v1921_v40 = vmul.f32 -1.442695, %v1208_v35  ;;  %v1922_v43 = vmul.f32 -1.442695, %v1221_v37  ;;  %vm1306_vm13 = vweird.f32 %v2297_v63 }
 0x17a   :  { %v2074_v38 = vpop.eup %2073  ;;  %v1260_v39 = vadd.f32 %v2070_v15, %v1259_v34  ;;  %v1313_v9 = vor.u32 1.1754944e-38, %v1312_v61  ;;  %vm1311_vm15 = vcmp.eq.f32.partialorder %v1310_v60, 8.507059e+37 }
 0x17b   :  { %v1275_v21 = vadd.f32 %v2072_v16, %v1274_v36  ;;  %v1287_v42 = vmul.f32 %v2074_v38, %v2295_v14  ;;  %v2076_v23 = vpop.eup %2075  ;;  %2081 = vpow2.f32 %v1921_v40  ;;  %vm1292_vm8 = vweird.f32 %v2074_v38 }
 0x17c   :  { %v1264_v44 = vsel %vm1263_vm5, %v2070_v15, %v1260_v39  ;;  %v1302_v49 = vmul.f32 %v2076_v23, %v2297_v63  ;;  %v2078_v50 = vpop.eup %2077  ;;  %2083 = vpow2.f32 %v1922_v43  ;;  %vm1307_vm10 = vweird.f32 %v2076_v23  ;;  %vm1293_vm11 = vmor %vm1291_vm9, %vm1292_vm8 }
 0x17d   :  { %v1269_v46 = vsel %vm1266_vm3, %v1268_v41, %v1264_v44  ;;  %v1279_v47 = vsel %vm1278_vm6, %v2072_v16, %v1275_v21  ;;  %v1288_v48 = vsub.f32 1.0, %v1287_v42  ;;  %v2080_v56 = vpop.eup %2079  ;;  %v1252_v59 = vadd.f32 1.0, %v2078_v50  ;;  %vm1308_vm14 = vmor %vm1306_vm13, %vm1307_vm10 }
 0x17e   :  { %1376 = vst [vmem:[#allocation10] sm:$0xff] %v1269_v46  ;;  %v1284_v51 = vsel %vm1281_vm7, %v1283_v45, %v1279_v47  ;;  %v1209_v54 = vpop.f32.mrf.mxu2  ;;  %v1222_v55 = vpop.f32.mrf.mxu3  ;;  %v1303_v58 = vsub.f32 1.0, %v1302_v49  ;;  %v1253_v62 = vadd.f32 1.0, %v2080_v56 }
 0x17f   :  { %1377 = vst [vmem:[#allocation10 + $0x8] sm:$0xff] %v1284_v51  ;;  %v1289_v57 = vmul.f32 %v2074_v38, %v1288_v48  ;;  %2085 = vrcp.f32 %v1252_v59  ;;  %v1325_v16 = vand.u32 2147483647, %v1252_v59  ;;  %v1327_v19 = vand.u32 2147483648, %v1252_v59 }
 0x180   :  { %v1304_v1 = vmul.f32 %v2076_v23, %v1303_v58  ;;  %2087 = vrcp.f32 %v1253_v62  ;;  %v1340_v20 = vand.u32 2147483647, %v1253_v62  ;;  %v1342_v24 = vand.u32 2147483648, %v1253_v62 }
 0x181   :  { %v1290_v0 = vadd.f32 %v2074_v38, %v1289_v57  ;;  %v2082_v2 = vpop.eup %2081  ;;  %vm1321_vm0 = vweird.f32 %v1252_v59  ;;  %vm1336_vm2 = vweird.f32 %v1253_v62  ;;  %vm2319_vm3 = vcmp.eq.f32.partialorder %v1325_v16, 8.507059e+37 }
 0x182   :  { %v1305_v6 = vadd.f32 %v2076_v23, %v1304_v1  ;;  %v2084_v7 = vpop.eup %2083  ;;  %v2313_v10 = vadd.f32 1.0, %v2082_v2  ;;  %v1328_v31 = vor.u32 1.1754944e-38, %v1327_v19  ;;  %vm2324_vm5 = vcmp.eq.f32.partialorder %v1340_v20, 8.507059e+37 }
 0x183   :  { %v1294_v5 = vsel %vm1293_vm11, %v2074_v38, %v1290_v0  ;;  %v2315_v12 = vadd.f32 1.0, %v2084_v7  ;;  %v1343_v35 = vor.u32 1.1754944e-38, %v1342_v24 }
 0x184   :  { %v1299_v8 = vsel %vm1296_vm12, %v1298_v3, %v1294_v5  ;;  %v1309_v11 = vsel %vm1308_vm14, %v2076_v23, %v1305_v6  ;;  %2089 = vrcp.f32 %v2313_v10  ;;  %v1355_v37 = vand.u32 2147483647, %v2313_v10 }
 0x185   :  { %1378 = vst [vmem:[#allocation10 + $0x10] sm:$0xff] %v1299_v8  ;;  %v1314_v13 = vsel %vm1311_vm15, %v1313_v9, %v1309_v11  ;;  %v2086_v14 = vpop.eup %2085  ;;  %2091 = vrcp.f32 %v2315_v12  ;;  %v1357_v39 = vand.u32 2147483648, %v2313_v10  ;;  %v1372_v41 = vand.u32 2147483648, %v2315_v12 }
 0x186   :  { %1379 = vst [vmem:[#allocation10 + $0x18] sm:$0xff] %v1314_v13  ;;  %v2088_v15 = vpop.eup %2087  ;;  %v1317_v63 = vmul.f32 %v2086_v14, %v1252_v59  ;;  %vm1322_vm1 = vweird.f32 %v2086_v14  ;;  %v1370_v45 = vand.u32 2147483647, %v2315_v12  ;;  %vm1351_vm10 = vweird.f32 %v2313_v10 }
 0x187   :  { %v1332_v17 = vmul.f32 %v2088_v15, %v1253_v62  ;;  %vm1337_vm4 = vweird.f32 %v2088_v15  ;;  %vm1323_vm6 = vmor %vm1321_vm0, %vm1322_vm1  ;;  %v1358_v47 = vor.u32 1.1754944e-38, %v1357_v39  ;;  %vm1366_vm12 = vweird.f32 %v2315_v12 }
 0x188   :  { %v1318_v18 = vsub.f32 1.0, %v1317_v63  ;;  %vm1338_vm7 = vmor %vm1336_vm2, %vm1337_vm4  ;;  %vm1356_vm13 = vcmp.eq.f32.partialorder %v1355_v37, 8.507059e+37  ;;  %v1373_v50 = vor.u32 1.1754944e-38, %v1372_v41  ;;  %vm1371_vm15 = vcmp.eq.f32.partialorder %v1370_v45, 8.507059e+37 }
 0x189   :  { %v1333_v22 = vsub.f32 1.0, %v1332_v17 }
 0x18a   :  { %v2090_v25 = vpop.eup %2089  ;;  %v1319_v26 = vmul.f32 %v2086_v14, %v1318_v18 }
 0x18b   :  { %v2092_v27 = vpop.eup %2091  ;;  %v1334_v29 = vmul.f32 %v2088_v15, %v1333_v22  ;;  %v1347_v30 = vmul.f32 %v2090_v25, %v2313_v10  ;;  %vm1352_vm8 = vweird.f32 %v2090_v25 }
 0x18c   :  { %v1320_v4 = vadd.f32 %v2086_v14, %v1319_v26  ;;  %v1362_v33 = vmul.f32 %v2092_v27, %v2315_v12  ;;  %vm1367_vm9 = vweird.f32 %v2092_v27  ;;  %vm1353_vm11 = vmor %vm1351_vm10, %vm1352_vm8 }
 0x18d   :  { %v1335_v34 = vadd.f32 %v2088_v15, %v1334_v29  ;;  %v1348_v36 = vsub.f32 1.0, %v1347_v30  ;;  %vm1368_vm14 = vmor %vm1366_vm12, %vm1367_vm9 }
 0x18e   :  { %v1324_v38 = vsel %vm1323_vm6, %v2086_v14, %v1320_v4  ;;  %v1363_v40 = vsub.f32 1.0, %v1362_v33 }
 0x18f   :  { %v1329_v21 = vsel %vm2319_vm3, %v1328_v31, %v1324_v38  ;;  %v1339_v42 = vsel %vm1338_vm7, %v2088_v15, %v1335_v34  ;;  %v1349_v43 = vmul.f32 %v2090_v25, %v1348_v36 }
 0x190   :  { %1380 = vst [vmem:[#allocation10 + $0x20] sm:$0xff] %v1329_v21  ;;  %v1344_v23 = vsel %vm2324_vm5, %v1343_v35, %v1339_v42  ;;  %v1364_v44 = vmul.f32 %v2092_v27, %v1363_v40 }
 0x191   :  { %1381 = vst [vmem:[#allocation10 + $0x28] sm:$0xff] %v1344_v23  ;;  %v1350_v46 = vadd.f32 %v2090_v25, %v1349_v43 }
 0x192   :  { %v1365_v48 = vadd.f32 %v2092_v27, %v1364_v44 }
 0x193   :  { %v1354_v49 = vsel %vm1353_vm11, %v2090_v25, %v1350_v46 }
 0x194   :  { %v1359_v51 = vsel %vm1356_vm13, %v1358_v47, %v1354_v49  ;;  %v1369_v52 = vsel %vm1368_vm14, %v2092_v27, %v1365_v48 }
 0x195   :  { %1382 = vst [vmem:[#allocation10 + $0x30] sm:$0xff] %v1359_v51  ;;  %v1374_v53 = vsel %vm1371_vm15, %v1373_v50, %v1369_v52 }
 0x196   :  { %1383 = vst [vmem:[#allocation10 + $0x38] sm:$0xff] %v1374_v53 }
 0x197   :  { %1394 = dma.vmem_to_hbm [thread:$0]  %s1390_s15, 1024, %s1392_s18, [#allocation4]  }
 0x198   :  { %2219 = dma.done.wait [#allocation4], 1024  }
 0x199   :  { %2220 = vsyncadd [#allocation4], 4294966272 }
 0x19a   :  { %1399 = vsyncpa [#allocation3], 1 }
 0x19b   :  { %1400 = vsyncpa [#allocation6], 1 }
 0x19c   :  { %1401 = vsyncpa [#allocation9], 1 }
 0x19d   :  { %1402 = vsyncpa [#allocation4], 1 }

</bundles_post_ra>
